<compile_context>
chip_gen: v6e
topology: v6e:2x2x1
jax: 0.10.0
libtpu: 0.0.40
codegen_flags: <defaults>
</compile_context>

<pallas_src>
import math

import jax
import jax.numpy as jnp
from jax.experimental import pallas as pl
from jax.experimental.pallas import tpu as pltpu


def _value_embedding_kernel(x_ref, w_ref, b_ref, o_ref):
    # x_ref: (TM, K) ; w_ref: (K, N) ; b_ref: (1, N) ; o_ref: (TM, N)
    acc = jnp.dot(x_ref[...], w_ref[...], preferred_element_type=jnp.float32)
    o_ref[...] = (acc + b_ref[...]).astype(o_ref.dtype)


def _round_up(x, m):
    return (x + m - 1) // m * m


def data_embedding(x, weight, bias, *, block_rows=1024, compute_dtype=None):
    """x: [B, S, c_in]; weight: [d_model, c_in] (PyTorch layout); bias: [d_model]."""
    B, S, c_in = x.shape
    d_model = weight.shape[0]
    M = B * S
    out_dtype = x.dtype

    # Optional bf16 path (v6e/v7x): halves HBM read traffic; accumulate stays f32.
    if compute_dtype is not None:
        x = x.astype(compute_dtype)
        weight = weight.astype(compute_dtype)

    x2d = x.reshape(M, c_in)
    w_t = weight.T                                    # (c_in, d_model)
    b2d = bias.reshape(1, d_model).astype(jnp.float32)

    # ---- lane-dense output packing (wrapper-side, exact) --------------------
    # Fold k consecutive rows into one so the output last dim (k * d_model) is
    # a multiple of 128.  The weight becomes block-diagonal; the reshape back
    # to (M, d_model) is a free row-major re-view.
    k = 1
    if d_model % 128 != 0:
        k = 128 // math.gcd(d_model, 128)
        if M % k != 0:
            k = 1                                     # fall back to masked stores
    if k > 1:
        x2d = x2d.reshape(M // k, k * c_in)
        w_t = jnp.kron(jnp.eye(k, dtype=w_t.dtype), w_t)   # (k*c_in, k*d_model)
        b2d = jnp.tile(b2d, (1, k))

    Mp, K = x2d.shape                                 # packed rows / contraction
    N = k * d_model                                   # lane-dense output width

    # ---- row tiling ----------------------------------------------------------
    if Mp <= block_rows:
        tm = Mp                                       # full-dim block (always legal)
    else:
        tm = block_rows                               # multiple of 8
    grid = (pl.cdiv(Mp, tm),)

    # ---- explicit VMEM budget (padded to (8, 128) tiles, double-buffered) ----
    in_isz = jnp.dtype(x2d.dtype).itemsize
    out_isz = jnp.dtype(out_dtype).itemsize
    x_tile = _round_up(tm, 8) * _round_up(K, 128) * in_isz
    o_tile = _round_up(tm, 8) * _round_up(N, 128) * out_isz
    w_bytes = _round_up(K, 8) * _round_up(N, 128) * in_isz
    b_bytes = 8 * _round_up(N, 128) * 4
    vmem_bytes = 2 * (x_tile + o_tile) + 2 * (w_bytes + b_bytes) + (1 << 20)
    vmem_bytes = int(min(max(vmem_bytes, 4 << 20), 64 << 20))

    # Memory-bound cost hint for XLA scheduling (flops are negligible here).
    cost = pl.CostEstimate(
        flops=2 * M * c_in * d_model,
        transcendentals=0,
        bytes_accessed=(Mp * K * in_isz + K * N * in_isz + N * 4
                        + Mp * N * out_isz),
    )

    out = pl.pallas_call(
        _value_embedding_kernel,
        out_shape=jax.ShapeDtypeStruct((Mp, N), out_dtype),
        grid=grid,
        in_specs=[
            pl.BlockSpec((tm, K), lambda i: (i, 0)),    # streamed row tiles
            pl.BlockSpec((K, N), lambda i: (0, 0)),     # weight: VMEM-resident
            pl.BlockSpec((1, N), lambda i: (0, 0)),     # bias:   VMEM-resident
        ],
        out_specs=pl.BlockSpec((tm, N), lambda i: (i, 0)),
        compiler_params=pltpu.CompilerParams(
            dimension_semantics=("parallel",),          # megacore on v7x
            vmem_limit_bytes=vmem_bytes,
        ),
        cost_estimate=cost,
    )(x2d, w_t, b2d)

    # TODO(synk): training-mode dropout omitted (identity in eval mode); fusing
    # it would use pltpu.prng_seed + pltpu.prng_random_bits on acc pre-store.
    return out.reshape(B, S, d_model)


def _reference(x, weight, bias):
    return jnp.einsum("bsc,dc->bsd", x, weight) + bias


if __name__ == "__main__":
    key = jax.random.PRNGKey(0)
    k_x, k_w, k_b = jax.random.split(key, 3)

    B, S, c_in, d_model = 2, 8, 4, 32

    # Deterministic params mirroring nn.Linear's U(-1/sqrt(c_in), 1/sqrt(c_in)).
    bound = 1.0 / math.sqrt(c_in)
    weight = jax.random.uniform(k_w, (d_model, c_in), jnp.float32, -bound, bound)
    bias = jax.random.uniform(k_b, (d_model,), jnp.float32, -bound, bound)

    x = jax.random.normal(k_x, (B, S, c_in), jnp.float32)

    y = data_embedding(x, weight, bias)
    y = jax.block_until_ready(y)

    y_ref = _reference(x, weight, bias)
    assert y.shape == (B, S, d_model)
    assert jnp.allclose(y, y_ref, atol=1e-5, rtol=1e-5)

    print("KERNEL_OK")
</pallas_src>

<mosaic_0001>
module attributes {stable_mosaic.version = 11 : i64} {
  func.func @_value_embedding_kernel(%arg0: i32, %arg1: memref<4x16xf32, #tpu.memory_space<vmem>>, %arg2: memref<16x128xf32, #tpu.memory_space<vmem>>, %arg3: memref<1x128xf32, #tpu.memory_space<vmem>>, %arg4: memref<4x128xf32, #tpu.memory_space<vmem>>) attributes {dimension_semantics = [#tpu.dimension_semantics<parallel>], iteration_bounds = array<i64: 1>, scalar_prefetch = 0 : i64, scratch_operands = 0 : i64, tpu.core_type = #tpu.core_type<tc>, window_params = [{transform_indices = @transform_0, window_bounds = array<i64: 4, 16>}, {pipeline_mode = #tpu.pipeline_mode<synchronous>, transform_indices = @transform_1, window_bounds = array<i64: 16, 128>}, {pipeline_mode = #tpu.pipeline_mode<synchronous>, transform_indices = @transform_2, window_bounds = array<i64: 1, 128>}, {transform_indices = @transform_3, window_bounds = array<i64: 4, 128>}]} {
    %c0 = arith.constant 0 : index
    %c0_0 = arith.constant 0 : index
    %0 = vector.load %arg1[%c0, %c0_0] : memref<4x16xf32, #tpu.memory_space<vmem>>, vector<4x16xf32>
    %c0_1 = arith.constant 0 : index
    %c0_2 = arith.constant 0 : index
    %1 = vector.load %arg2[%c0_1, %c0_2] : memref<16x128xf32, #tpu.memory_space<vmem>>, vector<16x128xf32>
    %cst = arith.constant dense<0.000000e+00> : vector<4x128xf32>
    %2 = tpu.matmul %0, %1, %cst {dimension_numbers = #tpu.dot_dimension_numbers<[1], [0], [0], [1], [0, 0, 1, 1], [], []>} : vector<4x16xf32>, vector<16x128xf32>, vector<4x128xf32> -> vector<4x128xf32>
    %c0_3 = arith.constant 0 : index
    %c0_4 = arith.constant 0 : index
    %3 = vector.load %arg3[%c0_3, %c0_4] : memref<1x128xf32, #tpu.memory_space<vmem>>, vector<1x128xf32>
    %4 = vector.broadcast %3 : vector<1x128xf32> to vector<4x128xf32>
    %5 = arith.addf %2, %4 : vector<4x128xf32>
    %c0_5 = arith.constant 0 : index
    %c0_6 = arith.constant 0 : index
    %6 = vector.load %arg4[%c0_5, %c0_6] : memref<4x128xf32, #tpu.memory_space<vmem>>, vector<4x128xf32>
    tpu.vector_store %arg4[%c0_5, %c0_6], %5 {strides = array<i32>} : memref<4x128xf32, #tpu.memory_space<vmem>>, vector<4x128xf32>,
    return
  }
  func.func @transform_0(%arg0: i32) -> (i32, i32) {
    %c0_i32 = arith.constant 0 : i32
    %c0_i32_0 = arith.constant 0 : i32
    return %arg0, %c0_i32 : i32, i32
  }
  func.func @transform_1(%arg0: i32) -> (i32, i32) {
    %c0_i32 = arith.constant 0 : i32
    %c0_i32_0 = arith.constant 0 : i32
    %c0_i32_1 = arith.constant 0 : i32
    return %c0_i32, %c0_i32_0 : i32, i32
  }
  func.func @transform_2(%arg0: i32) -> (i32, i32) {
    %c0_i32 = arith.constant 0 : i32
    %c0_i32_0 = arith.constant 0 : i32
    %c0_i32_1 = arith.constant 0 : i32
    return %c0_i32, %c0_i32_0 : i32, i32
  }
  func.func @transform_3(%arg0: i32) -> (i32, i32) {
    %c0_i32 = arith.constant 0 : i32
    %c0_i32_0 = arith.constant 0 : i32
    return %arg0, %c0_i32 : i32, i32
  }
}

</mosaic_0001>

<bundles_post_ra>
// kernel: tpu_custom_call.1
= control target key start
LH: loop header
LB: loop body
LE: loop exit
PB: predicated region body
PF: predicated region fallthrough
CT: control target
= control target key end

     0   :  { %8 = vsyncpa [#allocation3], 0  ;;  %s266_s0 = inlined_call_operand.hbm [shape: f32[4,16], index: 0, kind: input, shape index: {}]   ;;  %s267_s1 = inlined_call_operand.hbm [shape: f32[16,128], index: 1, kind: input, shape index: {}]   ;;  %s268_s2 = inlined_call_operand.vmem [shape: f32[1,128], index: 2, kind: input, shape index: {}]   ;;  %s269_s3 = inlined_call_operand.hbm [shape: f32[4,128], index: 3, kind: output, shape index: {}]  }
   0x1   :  { %9 = vsyncpa [#allocation6], 0 }
   0x2   :  { %10 = vsyncpa [#allocation4], 0  ;;  %s227_s12 = smov [#allocation2]   ;;  %s228_s14 = smov [#allocation5]  }
   0x3   :  { %s17_s13 = sshll.u32 %s227_s12, 4  ;;  %s26_s15 = sshll.u32 %s228_s14, 4  ;;  %s18_s13 = int_to_ptr.vmem [resolvable:$true] %s17_s13  ;;  %s27_s15 = int_to_ptr.vmem [resolvable:$true] %s26_s15 }
   0x4   :  { %s169_s16 = scalar_lea.vmem %s18_s13, 64  ;;  %p174_p1 = scmp.lt.s32.totalorder %s18_s13, %s18_s13 }
   0x5   :  { %p170_p0 = scmp.ne.s32.totalorder %s18_s13, %s169_s16  ;;  %p175_p2 = scmp.lt.s32.totalorder %s169_s16, %s169_s16 }
   0x7   :  { %p176_p3 = por %p175_p2, %p174_p1 }
   0x9   :  { %p177_p4 = pnand %p176_p3, %p170_p0 }
   0xb   :  { %180 = shalt.err (!%p177_p4)
}
   0xc   :  { %20 = dma.hbm_to_vmem [thread:$0]  %s266_s0, 64, %s18_s13, [#allocation3]  }
   0xd   :  { %s189_s19 = scalar_lea.vmem %s27_s15, 256  ;;  %p194_p6 = scmp.lt.s32.totalorder %s27_s15, %s27_s15 }
   0xe   :  { %p190_p5 = scmp.ne.s32.totalorder %s27_s15, %s189_s19  ;;  %p195_p7 = scmp.lt.s32.totalorder %s189_s19, %s189_s19 }
  0x10   :  { %p196_p8 = por %p195_p7, %p194_p6 }
  0x12   :  { %p197_p9 = pnand %p196_p8, %p190_p5 }
  0x14   :  { %200 = shalt.err (!%p197_p9)
}
  0x15   :  { %s229_s20 = smov 128   ;;  %s230_s21 = smov 8  }
  0x16   :  { %32 = dma.hbm_to_vmem [thread:$0]  %s267_s1, 256, %s27_s15, [#allocation6], %s229_s20, %s229_s20, %s230_s21  }
  0x17   :  { %221 = dma.done.wait [#allocation3], 64  }
  0x18   :  { %222 = vsyncadd [#allocation3], 4294967232 }
  0x19   :  { %223 = dma.done.wait [#allocation6], 256  }
  0x1a   :  { %224 = vsyncadd [#allocation6], 4294967040  ;;  %v231_v0 = vmov 0.0   ;;  %vm232_vm0 = vmmov 0   ;;  %v43_v1 = vld [vmem:[#allocation5 + $0x8] sm:$0xff]  ;;  %v42_v2 = vld [vmem:[#allocation5] sm:$0xff] }
  0x1b   :  { %147 = vmatprep.subr.mxu0 %v231_v0  ;;  %151 = vmatprep.mubr.msk.f32.mxu0 %vm232_vm0, %v231_v0  ;;  %v41_v3 = vld [vmem:[#allocation2] sm:$0xf]  ;;  %vm51_vm1 = vcmask 130048   ;;  %s233_s1 = smov [#allocation7]  }
  0x1c   :  { %148 = vmatpush3.msra.mxu0 %v43_v1  ;;  %v142_v4 = vld [vmem:[%s268_s2] ss:$0 sm:$0xff]  ;;  %s132_s25 = sshll.u32 %s233_s1, 4  ;;  %s133_s25 = int_to_ptr.vmem [resolvable:$true] %s132_s25 }
  0x1d   :  { %149 = vmatprep.subr.mxu0 %v231_v0  ;;  %s201_s26 = scalar_lea.vmem %s133_s25, 64  ;;  %p206_p11 = scmp.lt.s32.totalorder %s133_s25, %s133_s25 }
  0x1e   :  { %150 = vmatpush3.msra.mxu0 %v42_v2  ;;  %p202_p10 = scmp.ne.s32.totalorder %s133_s25, %s201_s26  ;;  %p207_p12 = scmp.lt.s32.totalorder %s201_s26, %s201_s26 }
  0x1f   :  { %152 = vmatmul.mubr.msk.f32.vlgmr.msra.gmra.mxu0 %vm51_vm1, %v41_v3 }
  0x20   :  { %p208_p13 = por %p207_p12, %p206_p11 }
  0x22   :  { %p209_p0 = pnand %p208_p13, %p202_p10 }
  0xdf   :  { %v121_v5 = vpop.f32.mrf.mxu0 }
  0xe0   :  { %v122_v6 = vadd.f32 %v142_v4, %v121_v5 }
  0xe1   :  { %v153_v7 = vpop.f32.mrf.mxu0 }
  0xe2   :  { %125 = vst [vmem:[#allocation7] sm:$0xf] %v122_v6 }
  0xe3   :  { %212 = shalt.err (!%p209_p0)
}
  0xe4   :  { %135 = dma.vmem_to_hbm [thread:$0]  %s133_s25, 64, %s269_s3, [#allocation4]  }
  0xe5   :  { %225 = dma.done.wait [#allocation4], 64  }
  0xe6   :  { %226 = vsyncadd [#allocation4], 4294967232 }
  0xe7   :  { %139 = vsyncpa [#allocation3], 1 }
  0xe8   :  { %140 = vsyncpa [#allocation6], 1 }
  0xe9   :  { %141 = vsyncpa [#allocation4], 1 }

</bundles_post_ra>
